<compile_context>
chip_gen: v7x
topology: tpu7x:2x2x1
jax: 0.10.0
libtpu: 0.0.40
codegen_flags: <defaults>
</compile_context>

<pallas_src>
import jax
import jax.numpy as jnp
from jax.experimental import pallas as pl
from jax.experimental.pallas import tpu as pltpu


# ----------------------------------------------------------------------------
# Kernels
# ----------------------------------------------------------------------------
def _scale_kernel(s_ref, x_ref, o_ref):
    # s_ref: (1,) scalar in SMEM; x_ref / o_ref: (tm, D) tile in VMEM.
    o_ref[...] = (x_ref[...] * s_ref[0]).astype(o_ref.dtype)


def _scale2_fused_kernel(s_ref, x1_ref, x2_ref, o1_ref, o2_ref):
    # s_ref: (2,) scalars in SMEM; both inputs share one grid / tiling.
    o1_ref[...] = (x1_ref[...] * s_ref[0]).astype(o1_ref.dtype)
    o2_ref[...] = (x2_ref[...] * s_ref[1]).astype(o2_ref.dtype)


# ----------------------------------------------------------------------------
# Wrappers
# ----------------------------------------------------------------------------
def _as_2d(x):
    """Flatten to (M, D) keeping the last dim lane-dense."""
    if x.ndim == 0:
        return x.reshape(1, 1)
    if x.ndim == 1:
        return x.reshape(1, -1)
    return x.reshape(-1, x.shape[-1])


def _pick_row_tile(m):
    """Largest row tile <= 1024 that is a multiple of 8 and divides M;
    otherwise a single full block (always layout-legal)."""
    if m <= 1024:
        return m
    for tm in (1024, 512, 256, 128, 64, 32, 16, 8):
        if m % tm == 0:
            return tm
    return m


def scale_by_scalar(x, scale):
    """x * scale with scale a 0-d parameter. Single tiled pallas_call."""
    orig_shape = x.shape
    x2 = _as_2d(x)
    m, d = x2.shape
    tm = _pick_row_tile(m)
    grid = (m // tm,)
    s = jnp.asarray(scale, dtype=jnp.float32).reshape(1)

    out = pl.pallas_call(
        _scale_kernel,
        out_shape=jax.ShapeDtypeStruct((m, d), x.dtype),
        grid=grid,
        in_specs=[
            pl.BlockSpec(memory_space=pltpu.MemorySpace.SMEM),
            pl.BlockSpec((tm, d), lambda i: (i, 0)),
        ],
        out_specs=pl.BlockSpec((tm, d), lambda i: (i, 0)),
        compiler_params=pltpu.CompilerParams(
            dimension_semantics=("parallel",)),
    )(s, x2)
    return out.reshape(orig_shape)


def scaling_factor_forward(input1, input2, scale1, scale2):
    """Pallas equivalent of ScalingFactor.forward."""
    if input1.shape == input2.shape and input1.dtype == input2.dtype:
        # Fused path: one kernel launch scales both tensors.
        orig_shape = input1.shape
        x1 = _as_2d(input1)
        x2 = _as_2d(input2)
        m, d = x1.shape
        tm = _pick_row_tile(m)
        grid = (m // tm,)
        s = jnp.stack([jnp.asarray(scale1, jnp.float32),
                       jnp.asarray(scale2, jnp.float32)]).reshape(2)
        tile_spec = pl.BlockSpec((tm, d), lambda i: (i, 0))

        o1, o2 = pl.pallas_call(
            _scale2_fused_kernel,
            out_shape=(jax.ShapeDtypeStruct((m, d), input1.dtype),
                       jax.ShapeDtypeStruct((m, d), input2.dtype)),
            grid=grid,
            in_specs=[
                pl.BlockSpec(memory_space=pltpu.MemorySpace.SMEM),
                tile_spec,
                tile_spec,
            ],
            out_specs=(tile_spec, tile_spec),
            compiler_params=pltpu.CompilerParams(
                dimension_semantics=("parallel",)),
        )(s, x1, x2)
        return o1.reshape(orig_shape), o2.reshape(orig_shape)

    # General path: shapes/dtypes differ -> one tiled kernel per input.
    return (scale_by_scalar(input1, scale1),
            scale_by_scalar(input2, scale2))


# ----------------------------------------------------------------------------
# Demo / self-test
# ----------------------------------------------------------------------------
if __name__ == "__main__":
    key = jax.random.PRNGKey(0)
    k1, k2 = jax.random.split(key)

    # Small shapes consistent with the module (output=768 hint): (batch=2, seq=8, 768)
    input1 = jax.random.normal(k1, (2, 8, 768), dtype=jnp.float32)
    input2 = jax.random.normal(k2, (2, 8, 768), dtype=jnp.float32)

    # nn.Parameter(torch.tensor(1.0)) initializes both scales to 1.0; use
    # non-trivial learned-like values here to actually exercise the multiply.
    scale1 = jnp.float32(1.25)
    scale2 = jnp.float32(-0.5)

    fwd = jax.jit(scaling_factor_forward)
    out1, out2 = fwd(input1, input2, scale1, scale2)
    out1, out2 = jax.block_until_ready((out1, out2))

    assert out1.shape == input1.shape and out2.shape == input2.shape
    assert out1.dtype == input1.dtype and out2.dtype == input2.dtype
    assert bool(jnp.allclose(out1, input1 * scale1, rtol=1e-6, atol=1e-6))
    assert bool(jnp.allclose(out2, input2 * scale2, rtol=1e-6, atol=1e-6))
    assert bool(jnp.all(jnp.isfinite(out1))) and bool(jnp.all(jnp.isfinite(out2)))
    print("KERNEL_OK")
</pallas_src>

<mosaic_0001>
module attributes {stable_mosaic.version = 11 : i64} {
  func.func @_scale2_fused_kernel(%arg0: i32, %arg1: memref<2xf32, #tpu.memory_space<smem>>, %arg2: memref<16x768xf32, #tpu.memory_space<vmem>>, %arg3: memref<16x768xf32, #tpu.memory_space<vmem>>, %arg4: memref<16x768xf32, #tpu.memory_space<vmem>>, %arg5: memref<16x768xf32, #tpu.memory_space<vmem>>) attributes {dimension_semantics = [#tpu.dimension_semantics<parallel>], iteration_bounds = array<i64: 1>, scalar_prefetch = 0 : i64, scratch_operands = 0 : i64, tpu.core_type = #tpu.core_type<tc>, window_params = [{transform_indices = @transform_0, window_bounds = array<i64: 2>}, {transform_indices = @transform_1, window_bounds = array<i64: 16, 768>}, {transform_indices = @transform_2, window_bounds = array<i64: 16, 768>}, {transform_indices = @transform_3, window_bounds = array<i64: 16, 768>}, {transform_indices = @transform_4, window_bounds = array<i64: 16, 768>}]} {
    %c0 = arith.constant 0 : index
    %c0_0 = arith.constant 0 : index
    %0 = vector.load %arg2[%c0, %c0_0] : memref<16x768xf32, #tpu.memory_space<vmem>>, vector<16x768xf32>
    %c0_1 = arith.constant 0 : index
    %1 = memref.load %arg1[%c0_1] : memref<2xf32, #tpu.memory_space<smem>>
    %2 = vector.broadcast %1 : f32 to vector<16x768xf32>
    %3 = arith.mulf %0, %2 : vector<16x768xf32>
    %c0_2 = arith.constant 0 : index
    %c0_3 = arith.constant 0 : index
    %4 = vector.load %arg4[%c0_2, %c0_3] : memref<16x768xf32, #tpu.memory_space<vmem>>, vector<16x768xf32>
    tpu.vector_store %arg4[%c0_2, %c0_3], %3 {strides = array<i32>} : memref<16x768xf32, #tpu.memory_space<vmem>>, vector<16x768xf32>,
    %c0_4 = arith.constant 0 : index
    %c0_5 = arith.constant 0 : index
    %5 = vector.load %arg3[%c0_4, %c0_5] : memref<16x768xf32, #tpu.memory_space<vmem>>, vector<16x768xf32>
    %c1 = arith.constant 1 : index
    %6 = memref.load %arg1[%c1] : memref<2xf32, #tpu.memory_space<smem>>
    %7 = vector.broadcast %6 : f32 to vector<16x768xf32>
    %8 = arith.mulf %5, %7 : vector<16x768xf32>
    %c0_6 = arith.constant 0 : index
    %c0_7 = arith.constant 0 : index
    %9 = vector.load %arg5[%c0_6, %c0_7] : memref<16x768xf32, #tpu.memory_space<vmem>>, vector<16x768xf32>
    tpu.vector_store %arg5[%c0_6, %c0_7], %8 {strides = array<i32>} : memref<16x768xf32, #tpu.memory_space<vmem>>, vector<16x768xf32>,
    return
  }
  func.func @transform_0(%arg0: i32) -> i32 {
    %c0_i32 = arith.constant 0 : i32
    %c0_i32_0 = arith.constant 0 : i32
    return %c0_i32 : i32
  }
  func.func @transform_1(%arg0: i32) -> (i32, i32) {
    %c0_i32 = arith.constant 0 : i32
    %c0_i32_0 = arith.constant 0 : i32
    return %arg0, %c0_i32 : i32, i32
  }
  func.func @transform_2(%arg0: i32) -> (i32, i32) {
    %c0_i32 = arith.constant 0 : i32
    %c0_i32_0 = arith.constant 0 : i32
    return %arg0, %c0_i32 : i32, i32
  }
  func.func @transform_3(%arg0: i32) -> (i32, i32) {
    %c0_i32 = arith.constant 0 : i32
    %c0_i32_0 = arith.constant 0 : i32
    return %arg0, %c0_i32 : i32, i32
  }
  func.func @transform_4(%arg0: i32) -> (i32, i32) {
    %c0_i32 = arith.constant 0 : i32
    %c0_i32_0 = arith.constant 0 : i32
    return %arg0, %c0_i32 : i32, i32
  }
}

</mosaic_0001>

<bundles_post_ra>
// kernel: scaling_factor_forward.1
= control target key start
LH: loop header
LB: loop body
LE: loop exit
PB: predicated region body
PF: predicated region fallthrough
CT: control target
= control target key end

     0   :  { %10 = vsyncpa [#allocation5], 0  ;;  %s396_s0 = inlined_call_operand.vmem [shape: f32[2], index: 0, kind: input, shape index: {}]   ;;  %s397_s1 = inlined_call_operand.hbm [shape: f32[16,768], index: 1, kind: input, shape index: {}]   ;;  %s398_s2 = inlined_call_operand.hbm [shape: f32[16,768], index: 2, kind: input, shape index: {}]   ;;  %s399_s3 = inlined_call_operand.hbm [shape: f32[16,768], index: 3, kind: output, shape index: {0}]   ;;  %s400_s4 = inlined_call_operand.hbm [shape: f32[16,768], index: 4, kind: output, shape index: {1}]  }
   0x1   :  { %11 = vsyncpa [#allocation3], 0 }
   0x2   :  { %12 = vsyncpa [#allocation8], 0 }
   0x3   :  { %13 = vsyncpa [#allocation4], 0 }
   0x4   :  { %14 = vsyncpa [#allocation11], 0  ;;  %s21_s17 = sshll.u32 %s396_s0, 4  ;;  %s22_s17 = int_to_ptr.vmem [resolvable:$true] %s21_s17 }
   0x5   :  { %s178_s18 = scalar_lea.vmem %s22_s17, 16  ;;  %p183_p1 = scmp.lt.s32.totalorder %s22_s17, %s22_s17 }
   0x6   :  { %p179_p0 = scmp.ne.s32.totalorder %s22_s17, %s178_s18  ;;  %p184_p2 = scmp.lt.s32.totalorder %s178_s18, %s178_s18 }
   0x8   :  { %p185_p3 = por %p184_p2, %p183_p1 }
   0xa   :  { %p186_p4 = pnand %p185_p3, %p179_p0 }
   0xc   :  { %189 = shalt.err (!%p186_p4)
}
   0xd   :  { %s288_s19 = smov [#allocation2]   ;;  %s289_s20 = smov [#allocation6]  }
   0xe   :  { %24 = dma.vmem_to_smem %s22_s17, 16, %s288_s19, [#allocation5]  }
   0xf   :  { %s30_s21 = sshll.u32 %s289_s20, 4  ;;  %s190_s24 = scalar_lea.hbm %s397_s1, 1536  ;;  %s31_s21 = int_to_ptr.vmem [resolvable:$true] %s30_s21 }
  0x10   :  { %p191_p5 = scmp.ne.s32.totalorder %s397_s1, %s190_s24  ;;  %p194_p6 = scmp.lt.u32.totalorder %s190_s24, %s397_s1 }
  0x12   :  { %p196_p7 = pnand %p194_p6, %p191_p5 }
  0x14   :  { %199 = shalt.err (!%p196_p7)
}
  0x15   :  { %s200_s28 = scalar_lea.vmem %s31_s21, 1536  ;;  %p205_p9 = scmp.lt.s32.totalorder %s31_s21, %s31_s21 }
  0x16   :  { %p201_p8 = scmp.ne.s32.totalorder %s31_s21, %s200_s28  ;;  %p206_p10 = scmp.lt.s32.totalorder %s200_s28, %s200_s28 }
  0x18   :  { %p207_p11 = por %p206_p10, %p205_p9 }
  0x1a   :  { %p208_p12 = pnand %p207_p11, %p201_p8 }
  0x1c   :  { %211 = shalt.err (!%p208_p12)
}
  0x1d   :  { %s290_s29 = smov 768   ;;  %s291_s30 = smov 48  }
  0x1e   :  { %36 = dma.hbm_to_vmem [thread:$0]  %s397_s1, 1536, %s31_s21, [#allocation3], %s290_s29, %s290_s29, %s291_s30  }
  0x1f   :  { %s292_s7 = smov [#allocation7]   ;;  %s212_s11 = scalar_lea.hbm %s398_s2, 1536 }
  0x20   :  { %s42_s8 = sshll.u32 %s292_s7, 4  ;;  %p213_p13 = scmp.ne.s32.totalorder %s398_s2, %s212_s11  ;;  %s43_s8 = int_to_ptr.vmem [resolvable:$true] %s42_s8 }
  0x21   :  { %p216_p0 = scmp.lt.u32.totalorder %s212_s11, %s398_s2 }
  0x23   :  { %p218_p1 = pnand %p216_p0, %p213_p13 }
  0x25   :  { %221 = shalt.err (!%p218_p1)
}
  0x26   :  { %s222_s16 = scalar_lea.vmem %s43_s8, 1536  ;;  %p227_p3 = scmp.lt.s32.totalorder %s43_s8, %s43_s8 }
  0x27   :  { %p223_p2 = scmp.ne.s32.totalorder %s43_s8, %s222_s16  ;;  %p228_p4 = scmp.lt.s32.totalorder %s222_s16, %s222_s16 }
  0x29   :  { %p229_p5 = por %p228_p4, %p227_p3 }
  0x2b   :  { %p230_p6 = pnand %p229_p5, %p223_p2 }
  0x2d   :  { %233 = shalt.err (!%p230_p6)
}
  0x2e   :  { %48 = dma.hbm_to_vmem [thread:$0]  %s398_s2, 1536, %s43_s8, [#allocation8], %s290_s29, %s290_s29, %s291_s30  }
  0x2f   :  { %278 = dma.done.wait [#allocation5], 16  }
  0x30   :  { %279 = vsyncadd [#allocation5], 4294967280 }
  0x31   :  { %280 = dma.done.wait [#allocation3], 1536  }
  0x32   :  { %281 = vsyncadd [#allocation3], 4294965760 }
  0x33   :  { %282 = dma.done.wait [#allocation8], 1536  }
  0x34   :  { %283 = vsyncadd [#allocation8], 4294965760 }
  0x35   :  { %58 = sfence }
  0x36   :  { %s71_s18 = sld [smem:[#allocation2]]  ;;  %s353_s19 = sld [smem:[#allocation2 + $0x1]]  ;;  %v59_v0 = vld [vmem:[#allocation6] sm:$0xff]  ;;  %v60_v1 = vld [vmem:[#allocation6 + $0x8] sm:$0xff]  ;;  %v61_v2 = vld [vmem:[#allocation6 + $0x10] sm:$0xff] }
  0x37   :  { %v62_v3 = vld [vmem:[#allocation6 + $0x18] sm:$0xff]  ;;  %v63_v4 = vld [vmem:[#allocation6 + $0x20] sm:$0xff]  ;;  %v64_v5 = vld [vmem:[#allocation6 + $0x28] sm:$0xff]  ;;  %s293_s2 = smov [#allocation9]   ;;  %s294_s21 = smov [#allocation10]  }
  0x38   :  { %v65_v6 = vld [vmem:[#allocation6 + $0x30] sm:$0xff]  ;;  %v66_v7 = vld [vmem:[#allocation6 + $0x38] sm:$0xff]  ;;  %v67_v8 = vld [vmem:[#allocation6 + $0x40] sm:$0xff]  ;;  %s140_s20 = sshll.u32 %s293_s2, 4  ;;  %s358_s22 = sshll.u32 %s294_s21, 4  ;;  %s355_s20 = int_to_ptr.vmem [resolvable:$true] %s140_s20  ;;  %s153_s22 = int_to_ptr.vmem [resolvable:$true] %s358_s22 }
  0x39   :  { %v68_v10 = vld [vmem:[#allocation6 + $0x48] sm:$0xff]  ;;  %v69_v11 = vld [vmem:[#allocation6 + $0x50] sm:$0xff]  ;;  %v70_v12 = vld [vmem:[#allocation6 + $0x58] sm:$0xff]  ;;  %s234_s23 = scalar_lea.vmem %s355_s20, 1536  ;;  %p239_p8 = scmp.lt.s32.totalorder %s355_s20, %s355_s20 }
  0x3a   :  { %v97_v17 = vld [vmem:[#allocation7] sm:$0xff]  ;;  %v98_v18 = vld [vmem:[#allocation7 + $0x8] sm:$0xff]  ;;  %v99_v19 = vld [vmem:[#allocation7 + $0x10] sm:$0xff]  ;;  %p235_p7 = scmp.ne.s32.totalorder %s355_s20, %s234_s23  ;;  %p240_p9 = scmp.lt.s32.totalorder %s234_s23, %s234_s23 }
  0x3b   :  { %v100_v24 = vld [vmem:[#allocation7 + $0x18] sm:$0xff]  ;;  %v101_v25 = vld [vmem:[#allocation7 + $0x20] sm:$0xff]  ;;  %v102_v26 = vld [vmem:[#allocation7 + $0x28] sm:$0xff] }
  0x3c   :  { %v72_v9 = vstv %s71_s18  ;;  %v103_v31 = vld [vmem:[#allocation7 + $0x30] sm:$0xff]  ;;  %v104_v32 = vld [vmem:[#allocation7 + $0x38] sm:$0xff]  ;;  %v105_v33 = vld [vmem:[#allocation7 + $0x40] sm:$0xff]  ;;  %v110_v34 = vstv %s353_s19  ;;  %p241_p10 = por %p240_p9, %p239_p8 }
  0x3d   :  { %v73_v13 = vmul.f32 %v72_v9, %v59_v0  ;;  %v74_v14 = vmul.f32 %v72_v9, %v60_v1  ;;  %v75_v15 = vmul.f32 %v72_v9, %v61_v2  ;;  %v76_v16 = vmul.f32 %v72_v9, %v62_v3  ;;  %v106_v35 = vld [vmem:[#allocation7 + $0x48] sm:$0xff]  ;;  %v107_v36 = vld [vmem:[#allocation7 + $0x50] sm:$0xff]  ;;  %v108_v37 = vld [vmem:[#allocation7 + $0x58] sm:$0xff] }
  0x3e   :  { %v77_v20 = vmul.f32 %v72_v9, %v63_v4  ;;  %v78_v21 = vmul.f32 %v72_v9, %v64_v5  ;;  %v79_v22 = vmul.f32 %v72_v9, %v65_v6  ;;  %v80_v23 = vmul.f32 %v72_v9, %v66_v7  ;;  %p242_p11 = pnand %p241_p10, %p235_p7 }
  0x3f   :  { %85 = vst [vmem:[#allocation9] sm:$0xff] %v73_v13  ;;  %86 = vst [vmem:[#allocation9 + $0x8] sm:$0xff] %v74_v14  ;;  %v81_v27 = vmul.f32 %v72_v9, %v67_v8  ;;  %v82_v28 = vmul.f32 %v72_v9, %v68_v10  ;;  %v83_v29 = vmul.f32 %v72_v9, %v69_v11 }
  0x40   :  { %87 = vst [vmem:[#allocation9 + $0x10] sm:$0xff] %v75_v15  ;;  %88 = vst [vmem:[#allocation9 + $0x18] sm:$0xff] %v76_v16  ;;  %v84_v30 = vmul.f32 %v72_v9, %v70_v12  ;;  %v111_v38 = vmul.f32 %v110_v34, %v97_v17  ;;  %v112_v39 = vmul.f32 %v110_v34, %v98_v18 }
  0x41   :  { %89 = vst [vmem:[#allocation9 + $0x20] sm:$0xff] %v77_v20  ;;  %90 = vst [vmem:[#allocation9 + $0x28] sm:$0xff] %v78_v21  ;;  %v113_v40 = vmul.f32 %v110_v34, %v99_v19  ;;  %v114_v41 = vmul.f32 %v110_v34, %v100_v24  ;;  %v115_v42 = vmul.f32 %v110_v34, %v101_v25 }
  0x42   :  { %91 = vst [vmem:[#allocation9 + $0x30] sm:$0xff] %v79_v22  ;;  %92 = vst [vmem:[#allocation9 + $0x38] sm:$0xff] %v80_v23  ;;  %v116_v43 = vmul.f32 %v110_v34, %v102_v26  ;;  %v117_v44 = vmul.f32 %v110_v34, %v103_v31  ;;  %v118_v45 = vmul.f32 %v110_v34, %v104_v32 }
  0x43   :  { %93 = vst [vmem:[#allocation9 + $0x40] sm:$0xff] %v81_v27  ;;  %94 = vst [vmem:[#allocation9 + $0x48] sm:$0xff] %v82_v28 }
  0x44   :  { %95 = vst [vmem:[#allocation9 + $0x50] sm:$0xff] %v83_v29  ;;  %96 = vst [vmem:[#allocation9 + $0x58] sm:$0xff] %v84_v30 }
  0x45   :  { %245 = shalt.err (!%p242_p11)
}
  0x46   :  { %s246_s26 = scalar_lea.hbm %s399_s3, 1536 }
  0x47   :  { %p247_p12 = scmp.ne.s32.totalorder %s399_s3, %s246_s26  ;;  %p250_p13 = scmp.lt.u32.totalorder %s246_s26, %s399_s3 }
  0x49   :  { %p252_p0 = pnand %p250_p13, %p247_p12 }
  0x4b   :  { %255 = shalt.err (!%p252_p0)
}
  0x4c   :  { %146 = dma.vmem_to_hbm [thread:$0]  %s355_s20, 1536, %s399_s3, [#allocation4], %s290_s29, %s290_s29, %s291_s30   ;;  %123 = vst [vmem:[#allocation10] sm:$0xff] %v111_v38  ;;  %124 = vst [vmem:[#allocation10 + $0x8] sm:$0xff] %v112_v39  ;;  %v119_v46 = vmul.f32 %v110_v34, %v105_v33  ;;  %v120_v47 = vmul.f32 %v110_v34, %v106_v35  ;;  %v121_v48 = vmul.f32 %v110_v34, %v107_v36 }
  0x4d   :  { %125 = vst [vmem:[#allocation10 + $0x10] sm:$0xff] %v113_v40  ;;  %126 = vst [vmem:[#allocation10 + $0x18] sm:$0xff] %v114_v41  ;;  %v122_v49 = vmul.f32 %v110_v34, %v108_v37  ;;  %s256_s8 = scalar_lea.vmem %s153_s22, 1536  ;;  %p261_p2 = scmp.lt.s32.totalorder %s153_s22, %s153_s22 }
  0x4e   :  { %127 = vst [vmem:[#allocation10 + $0x20] sm:$0xff] %v115_v42  ;;  %128 = vst [vmem:[#allocation10 + $0x28] sm:$0xff] %v116_v43  ;;  %p257_p1 = scmp.ne.s32.totalorder %s153_s22, %s256_s8  ;;  %p262_p3 = scmp.lt.s32.totalorder %s256_s8, %s256_s8 }
  0x4f   :  { %129 = vst [vmem:[#allocation10 + $0x30] sm:$0xff] %v117_v44  ;;  %130 = vst [vmem:[#allocation10 + $0x38] sm:$0xff] %v118_v45 }
  0x50   :  { %131 = vst [vmem:[#allocation10 + $0x40] sm:$0xff] %v119_v46  ;;  %132 = vst [vmem:[#allocation10 + $0x48] sm:$0xff] %v120_v47  ;;  %p263_p4 = por %p262_p3, %p261_p2 }
  0x51   :  { %133 = vst [vmem:[#allocation10 + $0x50] sm:$0xff] %v121_v48  ;;  %134 = vst [vmem:[#allocation10 + $0x58] sm:$0xff] %v122_v49 }
  0x52   :  { %p264_p5 = pnand %p263_p4, %p257_p1 }
  0x54   :  { %267 = shalt.err (!%p264_p5)
}
  0x55   :  { %s268_s10 = scalar_lea.hbm %s400_s4, 1536 }
  0x56   :  { %p269_p6 = scmp.ne.s32.totalorder %s400_s4, %s268_s10  ;;  %p272_p7 = scmp.lt.u32.totalorder %s268_s10, %s400_s4 }
  0x58   :  { %p274_p8 = pnand %p272_p7, %p269_p6 }
  0x5a   :  { %277 = shalt.err (!%p274_p8)
}
  0x5b   :  { %158 = dma.vmem_to_hbm [thread:$0]  %s153_s22, 1536, %s400_s4, [#allocation11], %s290_s29, %s290_s29, %s291_s30  }
  0x5c   :  { %284 = dma.done.wait [#allocation4], 1536  }
  0x5d   :  { %285 = vsyncadd [#allocation4], 4294965760 }
  0x5e   :  { %286 = dma.done.wait [#allocation11], 1536  }
  0x5f   :  { %287 = vsyncadd [#allocation11], 4294965760 }
  0x60   :  { %165 = vsyncpa [#allocation3], 1 }
  0x61   :  { %166 = vsyncpa [#allocation8], 1 }
  0x62   :  { %167 = vsyncpa [#allocation4], 1 }
  0x63   :  { %168 = vsyncpa [#allocation11], 1 }
  0x64   :  { %169 = vsyncpa [#allocation5], 1 }

</bundles_post_ra>
